<compile_context>
chip_gen: v7x
topology: tpu7x:2x2x1
jax: 0.10.0
libtpu: 0.0.40
codegen_flags: <defaults>
</compile_context>

<pallas_src>
import jax
import jax.numpy as jnp
from jax.experimental import pallas as pl
from jax.experimental.pallas import tpu as pltpu


def _identity_dma_kernel(x_hbm_ref, o_hbm_ref, sem):
    # Abstract BaseModel.forward defines no ops: the honest hot path is a
    # pass-through.  Single HBM->HBM DMA of the whole array; no VMEM staging.
    copy = pltpu.make_async_copy(x_hbm_ref, o_hbm_ref, sem)
    copy.start()
    copy.wait()


def base_model_forward(x: jax.Array, *, force_pallas: bool = True) -> jax.Array:
    """Pallas realization of BaseModel.forward (abstract -> identity).

    force_pallas=False returns `x` untouched (zero HBM traffic — the optimal
    implementation when the caller just needs the identity).  force_pallas=True
    materializes a fresh output buffer via a single HBM->HBM DMA copy.
    """
    if not force_pallas:
        return x

    nbytes = x.size * jnp.dtype(x.dtype).itemsize
    return pl.pallas_call(
        _identity_dma_kernel,
        out_shape=jax.ShapeDtypeStruct(x.shape, x.dtype),
        in_specs=[pl.BlockSpec(memory_space=pl.ANY)],
        out_specs=pl.BlockSpec(memory_space=pl.ANY),
        scratch_shapes=[pltpu.SemaphoreType.DMA],
        cost_estimate=pl.CostEstimate(
            flops=0, transcendentals=0, bytes_accessed=2 * nbytes
        ),
    )(x)


if __name__ == "__main__":
    key = jax.random.PRNGKey(0)

    # Small shapes consistent with the seq2seq convention:
    # batch=2, max_length(seq)=8, hidden_size=32.
    x = jax.random.normal(key, (2, 8, 32), dtype=jnp.float32)
    out = jax.block_until_ready(base_model_forward(x, force_pallas=True))
    assert out.shape == x.shape and out.dtype == x.dtype
    assert bool(jnp.allclose(out, x)), "identity forward mismatch (f32)"

    # Packed-dtype check (bf16): HBM->HBM DMA is layout/dtype agnostic, so no
    # min-tile or masked-store concerns apply.
    x_bf16 = jax.random.normal(key, (2, 8, 32), dtype=jnp.bfloat16)
    out_bf16 = jax.block_until_ready(base_model_forward(x_bf16, force_pallas=True))
    assert out_bf16.shape == x_bf16.shape and out_bf16.dtype == x_bf16.dtype
    assert bool(jnp.all(out_bf16 == x_bf16)), "identity forward mismatch (bf16)"

    # Zero-cost path (review's top recommendation): no kernel at all.
    out_fast = jax.block_until_ready(base_model_forward(x, force_pallas=False))
    assert bool(jnp.allclose(out_fast, x))

    print("KERNEL_OK")
</pallas_src>

<mosaic_0001>
module attributes {stable_mosaic.version = 11 : i64} {
  func.func @_identity_dma_kernel(%arg0: memref<2x8x32xf32, #tpu.memory_space<any>>, %arg1: memref<2x8x32xf32, #tpu.memory_space<any>>, %arg2: memref<!tpu.dma_semaphore, #tpu.memory_space<semaphore_mem>>) attributes {dimension_semantics = [], scalar_prefetch = 0 : i64, scratch_operands = 1 : i64, tpu.core_type = #tpu.core_type<tc>} {
    tpu.enqueue_dma source(%arg0 : memref<2x8x32xf32, #tpu.memory_space<any>>) target(%arg1 : memref<2x8x32xf32, #tpu.memory_space<any>>) target_semaphore(%arg2 : memref<!tpu.dma_semaphore, #tpu.memory_space<semaphore_mem>>)
    tpu.wait_dma2 semaphore(%arg2 : memref<!tpu.dma_semaphore, #tpu.memory_space<semaphore_mem>>) src(%arg0 : memref<2x8x32xf32, #tpu.memory_space<any>>) dst(%arg1 : memref<2x8x32xf32, #tpu.memory_space<any>>)
    return
  }
}

</mosaic_0001>

<bundles_post_ra>
// kernel: tpu_custom_call.1
= control target key start
LH: loop header
LB: loop body
LE: loop exit
PB: predicated region body
PF: predicated region fallthrough
CT: control target
= control target key end

     0   :  { %s35_s6 = smov [#allocation2]   ;;  %s36_s7 = smov [#allocation3]   ;;  %s54_s0 = inlined_call_operand.hbm [shape: f32[2,8,32], index: 0, kind: input, shape index: {}]   ;;  %s55_s1 = inlined_call_operand.hbm [shape: f32[2,8,32], index: 1, kind: output, shape index: {}]  }
   0x1   :  { %s37_s8 = smov 0  }
   0x2   :  { %18 = dma.general %s54_s0, 256, %s55_s1, %s35_s6, %s36_s7, [#allocation4], %s37_s8, 0  }
   0x3   :  { %33 = dma.done.wait [#allocation2], 256 }
   0x4   :  { %34 = vsyncadd [#allocation2], 4294967040 }
   0x5   :  { %23 = vsyncmov [#allocation2] }
   0x8   :  { %s24_s13 = vpop.sfrf %23 }
   0x9   :  { %p29_p0 = scmp.ne.s32.totalorder %s24_s13, 0 }
   0xb   :  { %28 = shalt.err (%p29_p0)  }

</bundles_post_ra>
